<compile_context>
chip_gen: v7x
topology: tpu7x:2x2x1
jax: 0.10.0
libtpu: 0.0.40
codegen_flags: <defaults>
</compile_context>

<pallas_src>
import jax
import jax.numpy as jnp
from jax import lax
from jax.experimental import pallas as pl
from jax.experimental.pallas import tpu as pltpu


def _mlp_kernel(x_ref,
                w1_ref, b1_ref,
                w2_ref, b2_ref,
                w3_ref, b3_ref,
                w4_ref, b4_ref,
                o_ref):
    """One batch tile of the 4-layer MLP.

    x_ref block: [batch_tile, input_dim] (natural HBM layout).  Layer 1
    contracts the trailing feature axis of both operands (NT matmul) and
    produces a [hidden, batch_tile] activation that is feature-on-sublane /
    batch-on-lane; that lane-dense layout is kept through layers 2-4, the
    sigmoid/softmax epilogue and the output store.
    """
    w_dtype = w1_ref.dtype
    x = x_ref[...]
    if x.dtype != w_dtype:
        x = x.astype(w_dtype)   # in-kernel cast: no extra HBM pass for bf16 MXU mode

    # Layer 1: [h1, in] x [bt, in] -> [h1, bt]; the in-kernel tile transpose is
    # XLU/VMEM work that hides under the DMA/MXU.
    h = lax.dot_general(w1_ref[...], x, (((1,), (1,)), ((), ())),
                        preferred_element_type=jnp.float32)
    h = jnp.maximum(h + b1_ref[...], 0.0)

    h = jnp.dot(w2_ref[...], h.astype(w_dtype),
                preferred_element_type=jnp.float32)
    h = jnp.maximum(h + b2_ref[...], 0.0)

    h = jnp.dot(w3_ref[...], h.astype(w_dtype),
                preferred_element_type=jnp.float32)
    h = jnp.maximum(h + b3_ref[...], 0.0)

    logits = jnp.dot(w4_ref[...], h.astype(w_dtype),
                     preferred_element_type=jnp.float32) + b4_ref[...]

    # sigmoid
    s = 1.0 / (1.0 + jnp.exp(-logits))

    # softmax over the class axis (axis 0 in this layout).  s is in (0, 1), so
    # exp(s) <= e and no max-shift is needed (saves an XLU reduce + VPU sub).
    e = jnp.exp(s)
    o_ref[...] = (e / jnp.sum(e, axis=0, keepdims=True)).astype(o_ref.dtype)


def _pick_batch_tile(bp, preferred):
    """Largest multiple of 256 that divides bp, is <= preferred, and (when bp
    is large enough) leaves >= 2 grid steps so megacore sharding of the
    "parallel" axis keeps both v7x TensorCores busy."""
    cap = min(preferred, bp if bp < 512 else bp // 2)
    tile = 256
    t = 256
    while t <= cap:
        if bp % t == 0:
            tile = t
        t += 256
    return tile


def contrastive_model_label_forward(x, params, *, batch_tile=2048,
                                    mxu_dtype=jnp.float32):
    """x: [B, input_dim] float32.  params: PyTorch layout {w_i: [out,in], b_i: [out]}.

    batch_tile is the *preferred* tile (multiple of 256); it is shrunk to fit
    the batch.  mxu_dtype=jnp.bfloat16 runs the MXU at native bf16 rate on
    v6e/v7x (x is cast in-kernel, accumulation stays f32); loosen tolerances
    if used.
    """
    B, input_dim = x.shape

    # Weights keep PyTorch [out, in] layout (one-time cast, tiny); biases become
    # column vectors so they broadcast over the lane-mapped batch axis.
    w1 = params["w1"].astype(mxu_dtype); b1 = params["b1"][:, None].astype(jnp.float32)
    w2 = params["w2"].astype(mxu_dtype); b2 = params["b2"][:, None].astype(jnp.float32)
    w3 = params["w3"].astype(mxu_dtype); b3 = params["b3"][:, None].astype(jnp.float32)
    w4 = params["w4"].astype(mxu_dtype); b4 = params["b4"][:, None].astype(jnp.float32)
    h1, h2 = w1.shape[0], w2.shape[0]
    h3, out_dim = w4.shape[1], w4.shape[0]   # 32, 2

    # Pad batch to a multiple of 256 with explicit zeros (never rely on OOB
    # tile contents); no transpose and no pad copy when B already divides.
    bp = pl.cdiv(B, 256) * 256
    if bp != B:
        x = jnp.pad(x, ((0, bp - B), (0, 0)))
    bt = _pick_batch_tile(bp, batch_tile)
    grid = (bp // bt,)

    # Advisory cost estimate so XLA can overlap the producer of x with us.
    flops = 2 * bp * (input_dim * h1 + h1 * h2 + h2 * h3 + h3 * out_dim)
    bytes_accessed = (bp * input_dim * x.dtype.itemsize
                      + bp * out_dim * 4
                      + int(w1.size + w2.size + w3.size + w4.size)
                      * jnp.dtype(mxu_dtype).itemsize)
    cost = pl.CostEstimate(flops=flops, transcendentals=4 * bp,
                           bytes_accessed=bytes_accessed)

    # VMEM budget: only set an explicit limit if the tile would exceed v5e's
    # 16 MiB default scoped VMEM (cap below v7x's 64 MiB physical VMEM).
    w_item = jnp.dtype(mxu_dtype).itemsize
    vmem_est = (2 * bt * input_dim * x.dtype.itemsize       # x block, double-buffered
                + 2 * bt * out_dim * 4                      # out block, double-buffered
                + bt * (h1 + h2 + h3 + out_dim) * 4         # f32 intermediates
                + int(w1.size + w2.size + w3.size + w4.size) * w_item
                + (h1 + h2 + h3 + out_dim) * 4)
    vmem_limit = None
    if 2 * vmem_est > (16 << 20):
        vmem_limit = min(int(2 * vmem_est), 48 << 20)

    def full_spec(shape):
        # Whole (small) array resident in VMEM, same block every grid step.
        return pl.BlockSpec(shape, lambda i: (0, 0))

    out_t = pl.pallas_call(
        _mlp_kernel,
        out_shape=jax.ShapeDtypeStruct((out_dim, bp), jnp.float32),
        grid=grid,
        in_specs=[
            pl.BlockSpec((bt, input_dim), lambda i: (i, 0)),   # natural x layout
            full_spec(w1.shape), full_spec(b1.shape),
            full_spec(w2.shape), full_spec(b2.shape),
            full_spec(w3.shape), full_spec(b3.shape),
            full_spec(w4.shape), full_spec(b4.shape),
        ],
        out_specs=pl.BlockSpec((out_dim, bt), lambda i: (0, i)),  # lane-dense output
        compiler_params=pltpu.CompilerParams(
            dimension_semantics=("parallel",),
            vmem_limit_bytes=vmem_limit),
        cost_estimate=cost,
    )(x, w1, b1, w2, b2, w3, b3, w4, b4)

    # Drop batch padding and return to the PyTorch [B, 2] layout (tiny copy).
    return out_t[:, :B].T


def init_params(key, input_dim, hidden_dim, hidden_dim_1):
    """Deterministic init mimicking nn.Linear default (uniform +-1/sqrt(fan_in))."""
    dims = [(hidden_dim, input_dim), (hidden_dim_1, hidden_dim),
            (32, hidden_dim_1), (2, 32)]
    params = {}
    keys = jax.random.split(key, 2 * len(dims))
    for idx, (out_d, in_d) in enumerate(dims):
        bound = 1.0 / (in_d ** 0.5)
        w = jax.random.uniform(keys[2 * idx], (out_d, in_d),
                               minval=-bound, maxval=bound, dtype=jnp.float32)
        b = jax.random.uniform(keys[2 * idx + 1], (out_d,),
                               minval=-bound, maxval=bound, dtype=jnp.float32)
        params[f"w{idx + 1}"] = w
        params[f"b{idx + 1}"] = b
    return params


def _reference_forward(x, params):
    """Pure-JAX reference matching the PyTorch forward."""
    h = jax.nn.relu(x @ params["w1"].T + params["b1"])
    h = jax.nn.relu(h @ params["w2"].T + params["b2"])
    h = jax.nn.relu(h @ params["w3"].T + params["b3"])
    s = jax.nn.sigmoid(h @ params["w4"].T + params["b4"])
    return jax.nn.softmax(s, axis=-1)


if __name__ == "__main__":
    key = jax.random.PRNGKey(0)
    k_param, k_x1, k_x2, k_x3 = jax.random.split(key, 4)

    input_dim, hidden_dim, hidden_dim_1 = 64, 128, 64
    params = init_params(k_param, input_dim, hidden_dim, hidden_dim_1)

    # Small ragged batch (padded inside the wrapper to one 256-wide tile).
    B_small = 8
    x_small = jax.random.normal(k_x1, (B_small, input_dim), dtype=jnp.float32)
    out_small = jax.block_until_ready(
        contrastive_model_label_forward(x_small, params))
    ref_small = _reference_forward(x_small, params)
    assert out_small.shape == (B_small, 2)
    assert jnp.allclose(out_small, ref_small, atol=1e-5, rtol=1e-4), \
        "mismatch vs reference (small batch)"

    # Ragged batch that needs zero-padding and two grid steps.
    B_rag = 300
    x_rag = jax.random.normal(k_x3, (B_rag, input_dim), dtype=jnp.float32)
    out_rag = jax.block_until_ready(
        contrastive_model_label_forward(x_rag, params))
    ref_rag = _reference_forward(x_rag, params)
    assert out_rag.shape == (B_rag, 2)
    assert jnp.allclose(out_rag, ref_rag, atol=1e-5, rtol=1e-4), \
        "mismatch vs reference (ragged batch)"

    # Larger batch exercising a multi-step ("parallel") grid.
    B_big = 512
    x_big = jax.random.normal(k_x2, (B_big, input_dim), dtype=jnp.float32)
    out_big = jax.block_until_ready(
        contrastive_model_label_forward(x_big, params))
    ref_big = _reference_forward(x_big, params)
    assert out_big.shape == (B_big, 2)
    assert jnp.allclose(out_big, ref_big, atol=1e-5, rtol=1e-4), \
        "mismatch vs reference (large batch)"

    print("KERNEL_OK")
</pallas_src>

<mosaic_0001>
module attributes {stable_mosaic.version = 11 : i64} {
  func.func @_mlp_kernel(%arg0: i32, %arg1: memref<256x64xf32, #tpu.memory_space<vmem>>, %arg2: memref<128x64xf32, #tpu.memory_space<vmem>>, %arg3: memref<128x1xf32, #tpu.memory_space<vmem>>, %arg4: memref<64x128xf32, #tpu.memory_space<vmem>>, %arg5: memref<64x1xf32, #tpu.memory_space<vmem>>, %arg6: memref<32x64xf32, #tpu.memory_space<vmem>>, %arg7: memref<32x1xf32, #tpu.memory_space<vmem>>, %arg8: memref<2x32xf32, #tpu.memory_space<vmem>>, %arg9: memref<2x1xf32, #tpu.memory_space<vmem>>, %arg10: memref<2x256xf32, #tpu.memory_space<vmem>>) attributes {dimension_semantics = [#tpu.dimension_semantics<parallel>], iteration_bounds = array<i64: 1>, scalar_prefetch = 0 : i64, scratch_operands = 0 : i64, tpu.core_type = #tpu.core_type<tc>, window_params = [{transform_indices = @transform_0, window_bounds = array<i64: 256, 64>}, {pipeline_mode = #tpu.pipeline_mode<synchronous>, transform_indices = @transform_1, window_bounds = array<i64: 128, 64>}, {pipeline_mode = #tpu.pipeline_mode<synchronous>, transform_indices = @transform_2, window_bounds = array<i64: 128, 1>}, {pipeline_mode = #tpu.pipeline_mode<synchronous>, transform_indices = @transform_3, window_bounds = array<i64: 64, 128>}, {pipeline_mode = #tpu.pipeline_mode<synchronous>, transform_indices = @transform_4, window_bounds = array<i64: 64, 1>}, {pipeline_mode = #tpu.pipeline_mode<synchronous>, transform_indices = @transform_5, window_bounds = array<i64: 32, 64>}, {pipeline_mode = #tpu.pipeline_mode<synchronous>, transform_indices = @transform_6, window_bounds = array<i64: 32, 1>}, {pipeline_mode = #tpu.pipeline_mode<synchronous>, transform_indices = @transform_7, window_bounds = array<i64: 2, 32>}, {pipeline_mode = #tpu.pipeline_mode<synchronous>, transform_indices = @transform_8, window_bounds = array<i64: 2, 1>}, {transform_indices = @transform_9, window_bounds = array<i64: 2, 256>}]} {
    %c0 = arith.constant 0 : index
    %c0_0 = arith.constant 0 : index
    %0 = vector.load %arg1[%c0, %c0_0] : memref<256x64xf32, #tpu.memory_space<vmem>>, vector<256x64xf32>
    %c0_1 = arith.constant 0 : index
    %c0_2 = arith.constant 0 : index
    %1 = vector.load %arg2[%c0_1, %c0_2] : memref<128x64xf32, #tpu.memory_space<vmem>>, vector<128x64xf32>
    %cst = arith.constant dense<0.000000e+00> : vector<128x256xf32>
    %2 = tpu.matmul %1, %0, %cst {dimension_numbers = #tpu.dot_dimension_numbers<[1], [1], [0], [0], [0, 0, 1, 0], [], []>} : vector<128x64xf32>, vector<256x64xf32>, vector<128x256xf32> -> vector<128x256xf32>
    %c0_3 = arith.constant 0 : index
    %c0_4 = arith.constant 0 : index
    %3 = vector.load %arg3[%c0_3, %c0_4] : memref<128x1xf32, #tpu.memory_space<vmem>>, vector<128x1xf32>
    %4 = vector.broadcast %3 : vector<128x1xf32> to vector<128x256xf32>
    %5 = arith.addf %2, %4 : vector<128x256xf32>
    %cst_5 = arith.constant 0.000000e+00 : f32
    %6 = vector.broadcast %cst_5 : f32 to vector<128x256xf32>
    %7 = arith.maximumf %5, %6 : vector<128x256xf32>
    %c0_6 = arith.constant 0 : index
    %c0_7 = arith.constant 0 : index
    %8 = vector.load %arg4[%c0_6, %c0_7] : memref<64x128xf32, #tpu.memory_space<vmem>>, vector<64x128xf32>
    %cst_8 = arith.constant dense<0.000000e+00> : vector<64x256xf32>
    %9 = tpu.matmul %8, %7, %cst_8 {dimension_numbers = #tpu.dot_dimension_numbers<[1], [0], [0], [1], [0, 0, 1, 1], [], []>} : vector<64x128xf32>, vector<128x256xf32>, vector<64x256xf32> -> vector<64x256xf32>
    %c0_9 = arith.constant 0 : index
    %c0_10 = arith.constant 0 : index
    %10 = vector.load %arg5[%c0_9, %c0_10] : memref<64x1xf32, #tpu.memory_space<vmem>>, vector<64x1xf32>
    %11 = vector.broadcast %10 : vector<64x1xf32> to vector<64x256xf32>
    %12 = arith.addf %9, %11 : vector<64x256xf32>
    %cst_11 = arith.constant 0.000000e+00 : f32
    %13 = vector.broadcast %cst_11 : f32 to vector<64x256xf32>
    %14 = arith.maximumf %12, %13 : vector<64x256xf32>
    %c0_12 = arith.constant 0 : index
    %c0_13 = arith.constant 0 : index
    %15 = vector.load %arg6[%c0_12, %c0_13] : memref<32x64xf32, #tpu.memory_space<vmem>>, vector<32x64xf32>
    %cst_14 = arith.constant dense<0.000000e+00> : vector<32x256xf32>
    %16 = tpu.matmul %15, %14, %cst_14 {dimension_numbers = #tpu.dot_dimension_numbers<[1], [0], [0], [1], [0, 0, 1, 1], [], []>} : vector<32x64xf32>, vector<64x256xf32>, vector<32x256xf32> -> vector<32x256xf32>
    %c0_15 = arith.constant 0 : index
    %c0_16 = arith.constant 0 : index
    %17 = vector.load %arg7[%c0_15, %c0_16] : memref<32x1xf32, #tpu.memory_space<vmem>>, vector<32x1xf32>
    %18 = vector.broadcast %17 : vector<32x1xf32> to vector<32x256xf32>
    %19 = arith.addf %16, %18 : vector<32x256xf32>
    %cst_17 = arith.constant 0.000000e+00 : f32
    %20 = vector.broadcast %cst_17 : f32 to vector<32x256xf32>
    %21 = arith.maximumf %19, %20 : vector<32x256xf32>
    %c0_18 = arith.constant 0 : index
    %c0_19 = arith.constant 0 : index
    %22 = vector.load %arg8[%c0_18, %c0_19] : memref<2x32xf32, #tpu.memory_space<vmem>>, vector<2x32xf32>
    %cst_20 = arith.constant dense<0.000000e+00> : vector<2x256xf32>
    %23 = tpu.matmul %22, %21, %cst_20 {dimension_numbers = #tpu.dot_dimension_numbers<[1], [0], [0], [1], [0, 0, 1, 1], [], []>} : vector<2x32xf32>, vector<32x256xf32>, vector<2x256xf32> -> vector<2x256xf32>
    %c0_21 = arith.constant 0 : index
    %c0_22 = arith.constant 0 : index
    %24 = vector.load %arg9[%c0_21, %c0_22] : memref<2x1xf32, #tpu.memory_space<vmem>>, vector<2x1xf32>
    %25 = vector.broadcast %24 : vector<2x1xf32> to vector<2x256xf32>
    %26 = arith.addf %23, %25 : vector<2x256xf32>
    %cst_23 = arith.constant 0.000000e+00 : f32
    %27 = vector.broadcast %cst_23 : f32 to vector<2x256xf32>
    %28 = arith.subf %27, %26 : vector<2x256xf32>
    %29 = math.exp %28 : vector<2x256xf32>
    %cst_24 = arith.constant 1.000000e+00 : f32
    %30 = vector.broadcast %cst_24 : f32 to vector<2x256xf32>
    %31 = arith.addf %30, %29 : vector<2x256xf32>
    %cst_25 = arith.constant 1.000000e+00 : f32
    %32 = vector.broadcast %cst_25 : f32 to vector<2x256xf32>
    %33 = arith.divf %32, %31 : vector<2x256xf32>
    %34 = math.exp %33 : vector<2x256xf32>
    %cst_26 = arith.constant dense<0.000000e+00> : vector<256xf32>
    %35 = vector.multi_reduction <add>, %34, %cst_26 [0] : vector<2x256xf32> to vector<256xf32>
    %36 = vector.shape_cast %35 : vector<256xf32> to vector<1x256xf32>
    %37 = vector.broadcast %36 : vector<1x256xf32> to vector<2x256xf32>
    %38 = arith.divf %34, %37 : vector<2x256xf32>
    %c0_27 = arith.constant 0 : index
    %c0_28 = arith.constant 0 : index
    %39 = vector.load %arg10[%c0_27, %c0_28] : memref<2x256xf32, #tpu.memory_space<vmem>>, vector<2x256xf32>
    tpu.vector_store %arg10[%c0_27, %c0_28], %38 {strides = array<i32>} : memref<2x256xf32, #tpu.memory_space<vmem>>, vector<2x256xf32>,
    return
  }
  func.func @transform_0(%arg0: i32) -> (i32, i32) {
    %c0_i32 = arith.constant 0 : i32
    %c0_i32_0 = arith.constant 0 : i32
    return %arg0, %c0_i32 : i32, i32
  }
  func.func @transform_1(%arg0: i32) -> (i32, i32) {
    %c0_i32 = arith.constant 0 : i32
    %c0_i32_0 = arith.constant 0 : i32
    %c0_i32_1 = arith.constant 0 : i32
    return %c0_i32, %c0_i32_0 : i32, i32
  }
  func.func @transform_2(%arg0: i32) -> (i32, i32) {
    %c0_i32 = arith.constant 0 : i32
    %c0_i32_0 = arith.constant 0 : i32
    %c0_i32_1 = arith.constant 0 : i32
    return %c0_i32, %c0_i32_0 : i32, i32
  }
  func.func @transform_3(%arg0: i32) -> (i32, i32) {
    %c0_i32 = arith.constant 0 : i32
    %c0_i32_0 = arith.constant 0 : i32
    %c0_i32_1 = arith.constant 0 : i32
    return %c0_i32, %c0_i32_0 : i32, i32
  }
  func.func @transform_4(%arg0: i32) -> (i32, i32) {
    %c0_i32 = arith.constant 0 : i32
    %c0_i32_0 = arith.constant 0 : i32
    %c0_i32_1 = arith.constant 0 : i32
    return %c0_i32, %c0_i32_0 : i32, i32
  }
  func.func @transform_5(%arg0: i32) -> (i32, i32) {
    %c0_i32 = arith.constant 0 : i32
    %c0_i32_0 = arith.constant 0 : i32
    %c0_i32_1 = arith.constant 0 : i32
    return %c0_i32, %c0_i32_0 : i32, i32
  }
  func.func @transform_6(%arg0: i32) -> (i32, i32) {
    %c0_i32 = arith.constant 0 : i32
    %c0_i32_0 = arith.constant 0 : i32
    %c0_i32_1 = arith.constant 0 : i32
    return %c0_i32, %c0_i32_0 : i32, i32
  }
  func.func @transform_7(%arg0: i32) -> (i32, i32) {
    %c0_i32 = arith.constant 0 : i32
    %c0_i32_0 = arith.constant 0 : i32
    %c0_i32_1 = arith.constant 0 : i32
    return %c0_i32, %c0_i32_0 : i32, i32
  }
  func.func @transform_8(%arg0: i32) -> (i32, i32) {
    %c0_i32 = arith.constant 0 : i32
    %c0_i32_0 = arith.constant 0 : i32
    %c0_i32_1 = arith.constant 0 : i32
    return %c0_i32, %c0_i32_0 : i32, i32
  }
  func.func @transform_9(%arg0: i32) -> (i32, i32) {
    %c0_i32 = arith.constant 0 : i32
    %c0_i32_0 = arith.constant 0 : i32
    return %c0_i32, %arg0 : i32, i32
  }
}

</mosaic_0001>

<bundles_post_ra>
// kernel: tpu_custom_call.1
= control target key start
LH: loop header
LB: loop body
LE: loop exit
PB: predicated region body
PF: predicated region fallthrough
CT: control target
= control target key end

     0   :  { %vm177_vm0 = vcmask 523264   ;;  %v1247_v7 = vmov 0   ;;  %s1673_s0 = inlined_call_operand.vmem [shape: f32[256,64], index: 0, kind: input, shape index: {}]   ;;  %s1674_s1 = inlined_call_operand.vmem [shape: f32[128,64], index: 1, kind: input, shape index: {}]   ;;  %s1675_s2 = inlined_call_operand.vmem [shape: f32[128,1], index: 2, kind: input, shape index: {}]   ;;  %s1676_s3 = inlined_call_operand.vmem [shape: f32[64,128], index: 3, kind: input, shape index: {}]   ;;  %s1677_s4 = inlined_call_operand.vmem [shape: f32[64,1], index: 4, kind: input, shape index: {}]   ;;  %s1678_s5 = inlined_call_operand.vmem [shape: f32[32,64], index: 5, kind: input, shape index: {}]   ;;  %s1679_s6 = inlined_call_operand.vmem [shape: f32[32,1], index: 6, kind: input, shape index: {}]   ;;  %s1680_s7 = inlined_call_operand.vmem [shape: f32[2,32], index: 7, kind: input, shape index: {}]   ;;  %s1681_s8 = inlined_call_operand.vmem [shape: f32[2,1], index: 8, kind: input, shape index: {}]   ;;  %s1682_s9 = inlined_call_operand.hbm [shape: f32[2,256], index: 9, kind: output, shape index: {}]  }
   0x1   :  { %v49_v0 = vld [vmem:[%s1673_s0 + $0x80] sm:$0xff]  ;;  %v50_v1 = vld [vmem:[%s1673_s0 + $0x88] sm:$0xff]  ;;  %vm1311_vm1 = vmpackc.low %vm177_vm0, %vm177_vm0  ;;  %1205 = vset.pattern.permute.xlu0 %v1247_v7  ;;  %1206 = vset.pattern.permute.xlu1 %v1247_v7 }
   0x2   :  { %v33_v2 = vld [vmem:[%s1673_s0] sm:$0xff]  ;;  %v1098_v3 = vpack.c.bf16 %v50_v1, %v49_v0  ;;  %v34_v5 = vld [vmem:[%s1673_s0 + $0x8] sm:$0xff]  ;;  %v51_v6 = vld [vmem:[%s1673_s0 + $0x90] sm:$0xff] }
   0x3   :  { %v1101_v8 = vpack.c.bf16 %v34_v5, %v33_v2  ;;  %v52_v9 = vld [vmem:[%s1673_s0 + $0x98] sm:$0xff]  ;;  %v35_v11 = vld [vmem:[%s1673_s0 + $0x10] sm:$0xff]  ;;  %v53_v13 = vld [vmem:[%s1673_s0 + $0xa0] sm:$0xff] }
   0x4   :  { %1100 = vmatprep.subr.msk.bf16.mxu0 %vm1311_vm1, %v1098_v3  ;;  %v1104_v10 = vpack.c.bf16 %v52_v9, %v51_v6  ;;  %v36_v12 = vld [vmem:[%s1673_s0 + $0x18] sm:$0xff]  ;;  %v54_v14 = vld [vmem:[%s1673_s0 + $0xa8] sm:$0xff]  ;;  %v1345_v17 = vld [vmem:[%s1674_s1] sm:$0xff] }
   0x5   :  { %1103 = vmatpush3.bf16.xpose.msk.msra.mxu0 %vm1311_vm1, %v1101_v8  ;;  %v1107_v15 = vpack.c.bf16 %v36_v12, %v35_v11  ;;  %v1110_v16 = vpack.c.bf16 %v54_v14, %v53_v13  ;;  %1066 = vmatprep.mubr.msk.f32.mxu0 %vm177_vm0, %v1345_v17  ;;  %v37_v18 = vld [vmem:[%s1673_s0 + $0x20] sm:$0xff]  ;;  %v38_v19 = vld [vmem:[%s1673_s0 + $0x28] sm:$0xff]  ;;  %v55_v20 = vld [vmem:[%s1673_s0 + $0xb0] sm:$0xff] }
   0x6   :  { %1106 = vmatprep.subr.msk.bf16.mxu0 %vm1311_vm1, %v1104_v10  ;;  %v56_v21 = vld [vmem:[%s1673_s0 + $0xb8] sm:$0xff]  ;;  %v1113_v22 = vpack.c.bf16 %v38_v19, %v37_v18  ;;  %v81_v23 = vld [vmem:[%s1675_s2] sm:$0xff]  ;;  %v83_v25 = vld [vmem:[%s1675_s2 + $0x10] sm:$0xff] }
   0x7   :  { %v1116_v24 = vpack.c.bf16 %v56_v21, %v55_v20  ;;  %99 = vperm.xlu0 %1205, %v81_v23   ;;  %v82_v26 = vld [vmem:[%s1675_s2 + $0x8] sm:$0xff]  ;;  %109 = vperm.xlu1 %1206, %v83_v25   ;;  %v84_v27 = vld [vmem:[%s1675_s2 + $0x18] sm:$0xff]  ;;  %v39_v28 = vld [vmem:[%s1673_s0 + $0x30] sm:$0xff] }
   0x8   :  { %v40_v29 = vld [vmem:[%s1673_s0 + $0x38] sm:$0xff]  ;;  %v57_v30 = vld [vmem:[%s1673_s0 + $0xc0] sm:$0xff]  ;;  %v58_v31 = vld [vmem:[%s1673_s0 + $0xc8] sm:$0xff] }
   0x9   :  { %v85_v32 = vld [vmem:[%s1675_s2 + $0x20] sm:$0xff]  ;;  %v86_v33 = vld [vmem:[%s1675_s2 + $0x28] sm:$0xff]  ;;  %v1119_v34 = vpack.c.bf16 %v40_v29, %v39_v28  ;;  %v1122_v35 = vpack.c.bf16 %v58_v31, %v57_v30  ;;  %v87_v36 = vld [vmem:[%s1675_s2 + $0x30] sm:$0xff] }
   0xb   :  { %104 = vperm.xlu0 %1205, %v82_v26   ;;  %114 = vperm.xlu1 %1206, %v84_v27  }
   0xd   :  { %1109 = vmatpush3.bf16.xpose.msk.msra.mxu0 %vm1311_vm1, %v1107_v15 }
   0xe   :  { %1112 = vmatprep.subr.msk.bf16.mxu0 %vm1311_vm1, %v1110_v16 }
   0xf   :  { %119 = vperm.xlu0 %1205, %v85_v32   ;;  %124 = vperm.xlu1 %1206, %v86_v33  }
  0x15   :  { %1115 = vmatpush3.bf16.xpose.msk.msra.mxu0 %vm1311_vm1, %v1113_v22 }
  0x16   :  { %1118 = vmatprep.subr.msk.bf16.mxu0 %vm1311_vm1, %v1116_v24 }
  0x17   :  { %14 = vsyncpa [#allocation3], 0  ;;  %v88_v37 = vld [vmem:[%s1675_s2 + $0x38] sm:$0xff]  ;;  %v41_v38 = vld [vmem:[%s1673_s0 + $0x40] sm:$0xff]  ;;  %129 = vperm.xlu0 %1205, %v87_v36   ;;  %v1248_v31 = vmov 0.0   ;;  %vm844_vm2 = vcmask 261120  }
  0x18   :  { %v42_v39 = vld [vmem:[%s1673_s0 + $0x48] sm:$0xff]  ;;  %v59_v40 = vld [vmem:[%s1673_s0 + $0xd0] sm:$0xff]  ;;  %v60_v41 = vld [vmem:[%s1673_s0 + $0xd8] sm:$0xff]  ;;  %134 = vperm.xlu1 %1206, %v88_v37   ;;  %635 = vmatprep.mubr.f32.mxu1 %v1248_v31  ;;  %vm935_vm3 = vcmask 1041408  }
  0x19   :  { %v89_v42 = vld [vmem:[%s1675_s2 + $0x40] sm:$0xff]  ;;  %v90_v43 = vld [vmem:[%s1675_s2 + $0x48] sm:$0xff]  ;;  %v1125_v44 = vpack.c.bf16 %v42_v39, %v41_v38  ;;  %v1128_v45 = vpack.c.bf16 %v60_v41, %v59_v40  ;;  %v91_v46 = vld [vmem:[%s1675_s2 + $0x50] sm:$0xff] }
  0x1a   :  { %v92_v47 = vld [vmem:[%s1675_s2 + $0x58] sm:$0xff]  ;;  %v43_v48 = vld [vmem:[%s1673_s0 + $0x50] sm:$0xff]  ;;  %v61_v50 = vld [vmem:[%s1673_s0 + $0xe0] sm:$0xff] }
  0x1b   :  { %139 = vperm.xlu0 %1205, %v89_v42   ;;  %v44_v49 = vld [vmem:[%s1673_s0 + $0x58] sm:$0xff]  ;;  %v62_v51 = vld [vmem:[%s1673_s0 + $0xe8] sm:$0xff]  ;;  %v93_v52 = vld [vmem:[%s1675_s2 + $0x60] sm:$0xff] }
  0x1c   :  { %144 = vperm.xlu1 %1206, %v90_v43   ;;  %v94_v53 = vld [vmem:[%s1675_s2 + $0x68] sm:$0xff]  ;;  %v1131_v54 = vpack.c.bf16 %v44_v49, %v43_v48  ;;  %v1134_v55 = vpack.c.bf16 %v62_v51, %v61_v50  ;;  %v95_v56 = vld [vmem:[%s1675_s2 + $0x70] sm:$0xff]  ;;  %v96_v57 = vld [vmem:[%s1675_s2 + $0x78] sm:$0xff] }
  0x1d   :  { %1121 = vmatpush3.bf16.xpose.msk.msra.mxu0 %vm1311_vm1, %v1119_v34  ;;  %v45_v58 = vld [vmem:[%s1673_s0 + $0x60] sm:$0xff]  ;;  %v46_v59 = vld [vmem:[%s1673_s0 + $0x68] sm:$0xff]  ;;  %v63_v60 = vld [vmem:[%s1673_s0 + $0xf0] sm:$0xff] }
  0x1e   :  { %1124 = vmatprep.subr.msk.bf16.mxu0 %vm1311_vm1, %v1122_v35  ;;  %v64_v61 = vld [vmem:[%s1673_s0 + $0xf8] sm:$0xff]  ;;  %v523_v62 = vld [vmem:[%s1677_s4] sm:$0xff]  ;;  %v524_v63 = vld [vmem:[%s1677_s4 + $0x8] sm:$0xff]  ;;  %v1137_v0 = vpack.c.bf16 %v46_v59, %v45_v58 }
  0x1f   :  { %149 = vperm.xlu0 %1205, %v91_v46   ;;  %v1140_v1 = vpack.c.bf16 %v64_v61, %v63_v60  ;;  %v525_v2 = vld [vmem:[%s1677_s4 + $0x10] sm:$0xff]  ;;  %v526_v3 = vld [vmem:[%s1677_s4 + $0x18] sm:$0xff]  ;;  %v527_v7 = vld [vmem:[%s1677_s4 + $0x20] sm:$0xff] }
  0x20   :  { %154 = vperm.xlu1 %1206, %v92_v47   ;;  %v47_v5 = vld [vmem:[%s1673_s0 + $0x70] sm:$0xff]  ;;  %v48_v6 = vld [vmem:[%s1673_s0 + $0x78] sm:$0xff]  ;;  %v528_v8 = vld [vmem:[%s1677_s4 + $0x28] sm:$0xff] }
  0x21   :  { %v1143_v9 = vpack.c.bf16 %v48_v6, %v47_v5  ;;  %v529_v10 = vld [vmem:[%s1677_s4 + $0x30] sm:$0xff]  ;;  %v530_v11 = vld [vmem:[%s1677_s4 + $0x38] sm:$0xff]  ;;  %v704_v12 = vld [vmem:[%s1679_s6] sm:$0xff] }
  0x22   :  { %v705_v13 = vld [vmem:[%s1679_s6 + $0x8] sm:$0xff]  ;;  %v706_v4 = vld [vmem:[%s1679_s6 + $0x10] sm:$0xff]  ;;  %v707_v15 = vld [vmem:[%s1679_s6 + $0x18] sm:$0xff] }
  0x23   :  { %159 = vperm.xlu0 %1205, %v93_v52   ;;  %v66_v14 = vld [vmem:[%s1674_s1 + $0x8] sm:$0xff]  ;;  %v67_v16 = vld [vmem:[%s1674_s1 + $0x10] sm:$0xff]  ;;  %v838_v18 = vld [vmem:[%s1681_s8] sm:$0x3] }
  0x24   :  { %164 = vperm.xlu1 %1206, %v94_v53   ;;  %v69_v19 = vld [vmem:[%s1674_s1 + $0x20] sm:$0xff]  ;;  %v70_v20 = vld [vmem:[%s1674_s1 + $0x28] sm:$0xff]  ;;  %v71_v21 = vld [vmem:[%s1674_s1 + $0x30] sm:$0xff] }
  0x25   :  { %1127 = vmatpush3.bf16.xpose.msk.msra.mxu0 %vm1311_vm1, %v1125_v44  ;;  %v72_v22 = vld [vmem:[%s1674_s1 + $0x38] sm:$0xff]  ;;  %v73_v23 = vld [vmem:[%s1674_s1 + $0x40] sm:$0xff]  ;;  %v74_v24 = vld [vmem:[%s1674_s1 + $0x48] sm:$0xff] }
  0x26   :  { %1130 = vmatprep.subr.msk.bf16.mxu0 %vm1311_vm1, %v1128_v45  ;;  %v75_v25 = vld [vmem:[%s1674_s1 + $0x50] sm:$0xff]  ;;  %v76_v26 = vld [vmem:[%s1674_s1 + $0x58] sm:$0xff]  ;;  %v77_v27 = vld [vmem:[%s1674_s1 + $0x60] sm:$0xff] }
  0x27   :  { %169 = vperm.xlu0 %1205, %v95_v56   ;;  %v78_v28 = vld [vmem:[%s1674_s1 + $0x68] sm:$0xff]  ;;  %v79_v29 = vld [vmem:[%s1674_s1 + $0x70] sm:$0xff]  ;;  %v80_v30 = vld [vmem:[%s1674_s1 + $0x78] sm:$0xff] }
  0x28   :  { %174 = vperm.xlu1 %1206, %v96_v57  }
  0x2b   :  { %533 = vperm.xlu0 %1205, %v523_v62  }
  0x2c   :  { %538 = vperm.xlu1 %1206, %v524_v63  }
  0x2d   :  { %1133 = vmatpush3.bf16.xpose.msk.msra.mxu0 %vm1311_vm1, %v1131_v54 }
  0x2e   :  { %1136 = vmatprep.subr.msk.bf16.mxu0 %vm1311_vm1, %v1134_v55 }
  0x2f   :  { %543 = vperm.xlu0 %1205, %v525_v2  }
  0x30   :  { %548 = vperm.xlu1 %1206, %v526_v3  }
  0x33   :  { %553 = vperm.xlu0 %1205, %v527_v7  }
  0x34   :  { %558 = vperm.xlu1 %1206, %v528_v8  }
  0x35   :  { %1139 = vmatpush3.bf16.xpose.msk.msra.mxu0 %vm1311_vm1, %v1137_v0 }
  0x36   :  { %1142 = vmatprep.subr.msk.bf16.mxu0 %vm1311_vm1, %v1140_v1 }
  0x37   :  { %563 = vperm.xlu0 %1205, %v529_v10  }
  0x38   :  { %568 = vperm.xlu1 %1206, %v530_v11  }
  0x3b   :  { %710 = vperm.xlu0 %1205, %v704_v12  }
  0x3c   :  { %715 = vperm.xlu1 %1206, %v705_v13  }
  0x3d   :  { %1145 = vmatpush3.bf16.xpose.msk.msra.mxu0 %vm1311_vm1, %v1143_v9 }
  0x3f   :  { %720 = vperm.xlu0 %1205, %v706_v4  }
  0x40   :  { %725 = vperm.xlu1 %1206, %v707_v15  }
  0x43   :  { %841 = vperm.xlu0 %1205, %v838_v18  }
  0x44   :  { %1067 = vmatmul.mubr.msk.f32.vlgmr.msra.gmra.mrb[0].mxu0 %vm177_vm0, %v1345_v17  ;;  %v68_v17 = vld [vmem:[%s1674_s1 + $0x18] sm:$0xff] }
  0x45   :  { %1068 = vmatprep.mubr.msk.f32.mxu0 %vm177_vm0, %v66_v14 }
  0x48   :  { %1069 = vmatmul.mubr.msk.f32.gmra.mrb[2].mxu0 %vm177_vm0, %v66_v14 }
  0x49   :  { %1070 = vmatprep.mubr.msk.f32.mxu0 %vm177_vm0, %v67_v16 }
  0x4c   :  { %1071 = vmatmul.mubr.msk.f32.gmra.mrb[4].mxu0 %vm177_vm0, %v67_v16 }
  0x4d   :  { %1072 = vmatprep.mubr.msk.f32.mxu0 %vm177_vm0, %v68_v17 }
  0x50   :  { %1073 = vmatmul.mubr.msk.f32.gmra.mrb[6].mxu0 %vm177_vm0, %v68_v17 }
  0x51   :  { %1074 = vmatprep.mubr.msk.f32.mxu0 %vm177_vm0, %v69_v19 }
  0x54   :  { %1075 = vmatmul.mubr.msk.f32.gmra.mrb[8].mxu0 %vm177_vm0, %v69_v19 }
  0x55   :  { %1076 = vmatprep.mubr.msk.f32.mxu0 %vm177_vm0, %v70_v20 }
  0x58   :  { %1077 = vmatmul.mubr.msk.f32.gmra.mrb[10].mxu0 %vm177_vm0, %v70_v20 }
  0x59   :  { %1078 = vmatprep.mubr.msk.f32.mxu0 %vm177_vm0, %v71_v21 }
  0x5c   :  { %1079 = vmatmul.mubr.msk.f32.gmra.mrb[12].mxu0 %vm177_vm0, %v71_v21 }
  0x5d   :  { %1080 = vmatprep.mubr.msk.f32.mxu0 %vm177_vm0, %v72_v22 }
  0x60   :  { %1081 = vmatmul.mubr.msk.f32.gmra.mrb[14].mxu0 %vm177_vm0, %v72_v22 }
  0x61   :  { %1082 = vmatprep.mubr.msk.f32.mxu0 %vm177_vm0, %v73_v23 }
  0x64   :  { %1083 = vmatmul.mubr.msk.f32.gmra.mrb[16].mxu0 %vm177_vm0, %v73_v23 }
  0x65   :  { %1084 = vmatprep.mubr.msk.f32.mxu0 %vm177_vm0, %v74_v24 }
  0x68   :  { %1085 = vmatmul.mubr.msk.f32.gmra.mrb[18].mxu0 %vm177_vm0, %v74_v24 }
  0x69   :  { %1086 = vmatprep.mubr.msk.f32.mxu0 %vm177_vm0, %v75_v25 }
  0x6c   :  { %1087 = vmatmul.mubr.msk.f32.gmra.mrb[20].mxu0 %vm177_vm0, %v75_v25 }
  0x6d   :  { %1088 = vmatprep.mubr.msk.f32.mxu0 %vm177_vm0, %v76_v26 }
  0x70   :  { %1089 = vmatmul.mubr.msk.f32.gmra.mrb[22].mxu0 %vm177_vm0, %v76_v26 }
  0x71   :  { %1090 = vmatprep.mubr.msk.f32.mxu0 %vm177_vm0, %v77_v27 }
  0x74   :  { %1091 = vmatmul.mubr.msk.f32.gmra.mrb[24].mxu0 %vm177_vm0, %v77_v27 }
  0x75   :  { %1092 = vmatprep.mubr.msk.f32.mxu0 %vm177_vm0, %v78_v28 }
  0x78   :  { %1093 = vmatmul.mubr.msk.f32.gmra.mrb[26].mxu0 %vm177_vm0, %v78_v28 }
  0x79   :  { %1094 = vmatprep.mubr.msk.f32.mxu0 %vm177_vm0, %v79_v29 }
  0x7c   :  { %1095 = vmatmul.mubr.msk.f32.gmra.mrb[28].mxu0 %vm177_vm0, %v79_v29 }
  0x7d   :  { %1096 = vmatprep.mubr.msk.f32.mxu0 %vm177_vm0, %v80_v30 }
  0x80   :  { %1097 = vmatmul.mubr.msk.f32.gmra.mrb[30].mxu0 %vm177_vm0, %v80_v30 }
  0x86   :  { %v100_v32 = vpop.permute.xlu0 %99  ;;  %v110_v41 = vpop.permute.xlu1 %109 }
  0x8a   :  { %v105_v36 = vpop.permute.xlu0 %104  ;;  %v115_v52 = vpop.permute.xlu1 %114 }
  0x8e   :  { %v120_v1 = vpop.permute.xlu0 %119  ;;  %v125_v5 = vpop.permute.xlu1 %124 }
  0x96   :  { %v130_v18 = vpop.permute.xlu0 %129 }
  0x97   :  { %v135_v20 = vpop.permute.xlu1 %134 }
 0x117   :  { %v388_v33 = vpop.f32.mrb[0].mxu0 }
 0x118   :  { %v390_v34 = vpop.f32.mrb[1].mxu0  ;;  %v389_v35 = vadd.f32 %v388_v33, %v100_v32 }
 0x119   :  { %v391_v37 = vadd.f32 %v390_v34, %v100_v32  ;;  %v140_v34 = vpop.permute.xlu0 %139 }
 0x11a   :  { %v483_v43 = vmax.f32 %v389_v35, 0.0 }
 0x11b   :  { %v394_v38 = vpop.f32.mrb[2].mxu0  ;;  %v484_v45 = vmax.f32 %v391_v37, 0.0  ;;  %v145_v37 = vpop.permute.xlu1 %144 }
 0x11c   :  { %v395_v39 = vadd.f32 %v394_v38, %v105_v36  ;;  %v396_v40 = vpop.f32.mrb[3].mxu0 }
 0x11d   :  { %v397_v42 = vadd.f32 %v396_v40, %v105_v36 }
 0x11e   :  { %v485_v44 = vmax.f32 %v395_v39, 0.0 }
 0x11f   :  { %v486_v46 = vmax.f32 %v397_v42, 0.0  ;;  %v400_v47 = vpop.f32.mrb[4].mxu0 }
 0x120   :  { %v402_v48 = vpop.f32.mrb[5].mxu0  ;;  %v1148_v49 = vpack.c.bf16 %v485_v44, %v483_v43  ;;  %v401_v51 = vadd.f32 %v400_v47, %v110_v41 }
 0x121   :  { %v1146_v50 = vpack.c.bf16 %v486_v46, %v484_v45  ;;  %v403_v53 = vadd.f32 %v402_v48, %v110_v41 }
 0x122   :  { %v487_v58 = vmax.f32 %v401_v51, 0.0 }
 0x123   :  { %v406_v54 = vpop.f32.mrb[6].mxu0  ;;  %1147 = vmatprep.subr.bf16.mxu1 %v1146_v50  ;;  %v488_v60 = vmax.f32 %v403_v53, 0.0  ;;  %v150_v50 = vpop.permute.xlu0 %149 }
 0x124   :  { %v407_v55 = vadd.f32 %v406_v54, %v115_v52  ;;  %v408_v56 = vpop.f32.mrb[7].mxu0  ;;  %1149 = vmatpush1.bf16.msra.mxu1 %v1148_v49  ;;  %v155_v53 = vpop.permute.xlu1 %154 }
 0x125   :  { %v409_v57 = vadd.f32 %v408_v56, %v115_v52 }
 0x126   :  { %v489_v59 = vmax.f32 %v407_v55, 0.0 }
 0x127   :  { %v490_v61 = vmax.f32 %v409_v57, 0.0  ;;  %v412_v62 = vpop.f32.mrb[8].mxu0 }
 0x128   :  { %v1152_v63 = vpack.c.bf16 %v489_v59, %v487_v58  ;;  %v414_v0 = vpop.f32.mrb[9].mxu0  ;;  %v413_v3 = vadd.f32 %v412_v62, %v120_v1 }
 0x129   :  { %v1150_v2 = vpack.c.bf16 %v490_v61, %v488_v60  ;;  %v415_v6 = vadd.f32 %v414_v0, %v120_v1 }
 0x12a   :  { %v491_v11 = vmax.f32 %v413_v3, 0.0 }
 0x12b   :  { %v418_v7 = vpop.f32.mrb[10].mxu0  ;;  %1151 = vmatprep.subr.bf16.mxu1 %v1150_v2  ;;  %v492_v13 = vmax.f32 %v415_v6, 0.0  ;;  %v160_v2 = vpop.permute.xlu0 %159 }
 0x12c   :  { %v419_v8 = vadd.f32 %v418_v7, %v125_v5  ;;  %v420_v9 = vpop.f32.mrb[11].mxu0  ;;  %1153 = vmatpush1.bf16.msra.mxu1 %v1152_v63  ;;  %v165_v6 = vpop.permute.xlu1 %164 }
 0x12d   :  { %v421_v10 = vadd.f32 %v420_v9, %v125_v5 }
 0x12e   :  { %v493_v12 = vmax.f32 %v419_v8, 0.0 }
 0x12f   :  { %v494_v14 = vmax.f32 %v421_v10, 0.0  ;;  %v424_v4 = vpop.f32.mrb[12].mxu0 }
 0x130   :  { %v1156_v15 = vpack.c.bf16 %v493_v12, %v491_v11  ;;  %v426_v16 = vpop.f32.mrb[13].mxu0  ;;  %v425_v19 = vadd.f32 %v424_v4, %v130_v18 }
 0x131   :  { %v1154_v17 = vpack.c.bf16 %v494_v14, %v492_v13  ;;  %v427_v21 = vadd.f32 %v426_v16, %v130_v18 }
 0x132   :  { %v495_v26 = vmax.f32 %v425_v19, 0.0 }
 0x133   :  { %v430_v22 = vpop.f32.mrb[14].mxu0  ;;  %1155 = vmatprep.subr.bf16.mxu1 %v1154_v17  ;;  %v496_v28 = vmax.f32 %v427_v21, 0.0  ;;  %v170_v17 = vpop.permute.xlu0 %169 }
 0x134   :  { %v431_v23 = vadd.f32 %v430_v22, %v135_v20  ;;  %v432_v24 = vpop.f32.mrb[15].mxu0  ;;  %1157 = vmatpush1.bf16.msra.mxu1 %v1156_v15  ;;  %v175_v21 = vpop.permute.xlu1 %174 }
 0x135   :  { %v433_v25 = vadd.f32 %v432_v24, %v135_v20 }
 0x136   :  { %v497_v27 = vmax.f32 %v431_v23, 0.0 }
 0x137   :  { %v498_v29 = vmax.f32 %v433_v25, 0.0  ;;  %v436_v30 = vpop.f32.mrb[16].mxu0 }
 0x138   :  { %v1160_v32 = vpack.c.bf16 %v497_v27, %v495_v26  ;;  %v438_v33 = vpop.f32.mrb[17].mxu0  ;;  %v437_v36 = vadd.f32 %v436_v30, %v140_v34 }
 0x139   :  { %v1158_v35 = vpack.c.bf16 %v498_v29, %v496_v28  ;;  %v439_v38 = vadd.f32 %v438_v33, %v140_v34  ;;  %v515_v34 = vld [vmem:[%s1676_s3] sm:$0xff] }
 0x13a   :  { %v499_v43 = vmax.f32 %v437_v36, 0.0  ;;  %v517_v36 = vld [vmem:[%s1676_s3 + $0x10] sm:$0xff] }
 0x13b   :  { %v442_v39 = vpop.f32.mrb[18].mxu0  ;;  %1159 = vmatprep.subr.bf16.mxu1 %v1158_v35  ;;  %v500_v45 = vmax.f32 %v439_v38, 0.0  ;;  %v516_v35 = vld [vmem:[%s1676_s3 + $0x8] sm:$0xff]  ;;  %v519_v38 = vld [vmem:[%s1676_s3 + $0x20] sm:$0xff] }
 0x13c   :  { %v443_v40 = vadd.f32 %v442_v39, %v145_v37  ;;  %v444_v41 = vpop.f32.mrb[19].mxu0  ;;  %1161 = vmatpush1.bf16.msra.mxu1 %v1160_v32  ;;  %v520_v39 = vld [vmem:[%s1676_s3 + $0x28] sm:$0xff] }
 0x13d   :  { %v445_v42 = vadd.f32 %v444_v41, %v145_v37  ;;  %v518_v37 = vld [vmem:[%s1676_s3 + $0x18] sm:$0xff] }
 0x13e   :  { %v501_v44 = vmax.f32 %v443_v40, 0.0  ;;  %v521_v40 = vld [vmem:[%s1676_s3 + $0x30] sm:$0xff]  ;;  %v522_v41 = vld [vmem:[%s1676_s3 + $0x38] sm:$0xff] }
 0x13f   :  { %v502_v46 = vmax.f32 %v445_v42, 0.0  ;;  %v448_v47 = vpop.f32.mrb[20].mxu0 }
 0x140   :  { %v1164_v48 = vpack.c.bf16 %v501_v44, %v499_v43  ;;  %v450_v49 = vpop.f32.mrb[21].mxu0  ;;  %v449_v52 = vadd.f32 %v448_v47, %v150_v50  ;;  %v534_v44 = vpop.permute.xlu0 %533 }
 0x141   :  { %v1162_v51 = vpack.c.bf16 %v502_v46, %v500_v45  ;;  %v451_v54 = vadd.f32 %v450_v49, %v150_v50  ;;  %v539_v46 = vpop.permute.xlu1 %538 }
 0x142   :  { %v503_v59 = vmax.f32 %v449_v52, 0.0 }
 0x143   :  { %v454_v55 = vpop.f32.mrb[22].mxu0  ;;  %1163 = vmatprep.subr.bf16.mxu1 %v1162_v51  ;;  %v504_v61 = vmax.f32 %v451_v54, 0.0 }
 0x144   :  { %v455_v56 = vadd.f32 %v454_v55, %v155_v53  ;;  %v456_v57 = vpop.f32.mrb[23].mxu0  ;;  %1165 = vmatpush1.bf16.msra.mxu1 %v1164_v48 }
 0x145   :  { %v457_v58 = vadd.f32 %v456_v57, %v155_v53 }
 0x146   :  { %v505_v60 = vmax.f32 %v455_v56, 0.0 }
 0x147   :  { %v506_v62 = vmax.f32 %v457_v58, 0.0  ;;  %v460_v63 = vpop.f32.mrb[24].mxu0 }
 0x148   :  { %v1168_v0 = vpack.c.bf16 %v505_v60, %v503_v59  ;;  %v462_v1 = vpop.f32.mrb[25].mxu0  ;;  %v461_v5 = vadd.f32 %v460_v63, %v160_v2  ;;  %v544_v59 = vpop.permute.xlu0 %543 }
 0x149   :  { %v1166_v3 = vpack.c.bf16 %v506_v62, %v504_v61  ;;  %v463_v7 = vadd.f32 %v462_v1, %v160_v2  ;;  %v549_v62 = vpop.permute.xlu1 %548 }
 0x14a   :  { %v507_v12 = vmax.f32 %v461_v5, 0.0 }
 0x14b   :  { %v466_v8 = vpop.f32.mrb[26].mxu0  ;;  %1167 = vmatprep.subr.bf16.mxu1 %v1166_v3  ;;  %v508_v14 = vmax.f32 %v463_v7, 0.0 }
 0x14c   :  { %v467_v9 = vadd.f32 %v466_v8, %v165_v6  ;;  %v468_v10 = vpop.f32.mrb[27].mxu0  ;;  %1169 = vmatpush1.bf16.msra.mxu1 %v1168_v0 }
 0x14d   :  { %v469_v11 = vadd.f32 %v468_v10, %v165_v6 }
 0x14e   :  { %v509_v13 = vmax.f32 %v467_v9, 0.0 }
 0x14f   :  { %v510_v4 = vmax.f32 %v469_v11, 0.0  ;;  %v472_v15 = vpop.f32.mrb[28].mxu0 }
 0x150   :  { %v1172_v16 = vpack.c.bf16 %v509_v13, %v507_v12  ;;  %v474_v18 = vpop.f32.mrb[29].mxu0  ;;  %v473_v20 = vadd.f32 %v472_v15, %v170_v17  ;;  %v554_v12 = vpop.permute.xlu0 %553 }
 0x151   :  { %v1170_v19 = vpack.c.bf16 %v510_v4, %v508_v14  ;;  %v475_v22 = vadd.f32 %v474_v18, %v170_v17  ;;  %v559_v4 = vpop.permute.xlu1 %558 }
 0x152   :  { %v511_v27 = vmax.f32 %v473_v20, 0.0 }
 0x153   :  { %v478_v23 = vpop.f32.mrb[30].mxu0  ;;  %1171 = vmatprep.subr.bf16.mxu1 %v1170_v19  ;;  %v512_v29 = vmax.f32 %v475_v22, 0.0 }
 0x154   :  { %v479_v24 = vadd.f32 %v478_v23, %v175_v21  ;;  %v480_v25 = vpop.f32.mrb[31].mxu0  ;;  %1173 = vmatpush1.bf16.msra.mxu1 %v1172_v16 }
 0x155   :  { %v481_v26 = vadd.f32 %v480_v25, %v175_v21 }
 0x156   :  { %v513_v28 = vmax.f32 %v479_v24, 0.0 }
 0x157   :  { %v514_v30 = vmax.f32 %v481_v26, 0.0 }
 0x158   :  { %v1176_v32 = vpack.c.bf16 %v513_v28, %v511_v27  ;;  %v564_v27 = vpop.permute.xlu0 %563 }
 0x159   :  { %v1174_v33 = vpack.c.bf16 %v514_v30, %v512_v29  ;;  %v569_v30 = vpop.permute.xlu1 %568 }
 0x15b   :  { %1175 = vmatprep.subr.bf16.mxu1 %v1174_v33 }
 0x15c   :  { %1177 = vmatpush1.bf16.msra.mxu1 %v1176_v32 }
 0x15f   :  { %636 = vmatmul.mubr.f32.vlgmr.msra.gmra.mrb[0].mxu1 %v515_v34 }
 0x160   :  { %641 = vmatprep.mubr.f32.mxu1 %v1248_v31 }
 0x163   :  { %642 = vmatmul.mubr.f32.gmra.mrb[2].mxu1 %v516_v35 }
 0x164   :  { %647 = vmatprep.mubr.f32.mxu1 %v1248_v31 }
 0x167   :  { %648 = vmatmul.mubr.f32.gmra.mrb[4].mxu1 %v517_v36 }
 0x168   :  { %653 = vmatprep.mubr.f32.mxu1 %v1248_v31 }
 0x16b   :  { %654 = vmatmul.mubr.f32.gmra.mrb[6].mxu1 %v518_v37 }
 0x16c   :  { %659 = vmatprep.mubr.f32.mxu1 %v1248_v31 }
 0x16f   :  { %660 = vmatmul.mubr.f32.gmra.mrb[8].mxu1 %v519_v38 }
 0x170   :  { %665 = vmatprep.mubr.f32.mxu1 %v1248_v31 }
 0x173   :  { %666 = vmatmul.mubr.f32.gmra.mrb[10].mxu1 %v520_v39 }
 0x174   :  { %671 = vmatprep.mubr.f32.mxu1 %v1248_v31 }
 0x177   :  { %672 = vmatmul.mubr.f32.gmra.mrb[12].mxu1 %v521_v40 }
 0x178   :  { %677 = vmatprep.mubr.f32.mxu1 %v1248_v31 }
 0x17b   :  { %678 = vmatmul.mubr.f32.gmra.mrb[14].mxu1 %v522_v41 }
 0x17c   :  { %804 = vmatprep.mubr.f32.mxu1 %v1248_v31 }
 0x232   :  { %v637_v42 = vpop.f32.mrb[0].mxu1 }
 0x233   :  { %v639_v43 = vpop.f32.mrb[1].mxu1  ;;  %v638_v45 = vadd.f32 %v637_v42, %v534_v44 }
 0x234   :  { %v640_v47 = vadd.f32 %v639_v43, %v534_v44  ;;  %v700_v43 = vld [vmem:[%s1678_s5] sm:$0xff]  ;;  %v701_v44 = vld [vmem:[%s1678_s5 + $0x8] sm:$0xff] }
 0x235   :  { %v684_v52 = vmax.f32 %v638_v45, 0.0  ;;  %v702_v45 = vld [vmem:[%s1678_s5 + $0x10] sm:$0xff] }
 0x236   :  { %v643_v48 = vpop.f32.mrb[2].mxu1  ;;  %v685_v54 = vmax.f32 %v640_v47, 0.0 }
 0x237   :  { %v644_v49 = vadd.f32 %v643_v48, %v539_v46  ;;  %v645_v50 = vpop.f32.mrb[3].mxu1 }
 0x238   :  { %v646_v51 = vadd.f32 %v645_v50, %v539_v46  ;;  %v703_v46 = vld [vmem:[%s1678_s5 + $0x18] sm:$0xff] }
 0x239   :  { %v686_v53 = vmax.f32 %v644_v49, 0.0  ;;  %v711_v49 = vpop.permute.xlu0 %710 }
 0x23a   :  { %v687_v55 = vmax.f32 %v646_v51, 0.0  ;;  %v649_v56 = vpop.f32.mrb[4].mxu1  ;;  %v716_v51 = vpop.permute.xlu1 %715 }
 0x23b   :  { %v1180_v57 = vpack.c.bf16 %v686_v53, %v684_v52  ;;  %v651_v58 = vpop.f32.mrb[5].mxu1  ;;  %v650_v61 = vadd.f32 %v649_v56, %v544_v59 }
 0x23c   :  { %v1178_v60 = vpack.c.bf16 %v687_v55, %v685_v54  ;;  %v652_v63 = vadd.f32 %v651_v58, %v544_v59 }
 0x23d   :  { %v688_v5 = vmax.f32 %v650_v61, 0.0 }
 0x23e   :  { %v655_v0 = vpop.f32.mrb[6].mxu1  ;;  %1179 = vmatprep.subr.bf16.mxu1 %v1178_v60  ;;  %v689_v7 = vmax.f32 %v652_v63, 0.0 }
 0x23f   :  { %v656_v1 = vadd.f32 %v655_v0, %v549_v62  ;;  %v657_v2 = vpop.f32.mrb[7].mxu1  ;;  %1181 = vmatpush1.bf16.msra.mxu1 %v1180_v57  ;;  %v721_v0 = vpop.permute.xlu0 %720 }
 0x240   :  { %v658_v3 = vadd.f32 %v657_v2, %v549_v62  ;;  %v726_v2 = vpop.permute.xlu1 %725 }
 0x241   :  { %v690_v6 = vmax.f32 %v656_v1, 0.0 }
 0x242   :  { %v691_v8 = vmax.f32 %v658_v3, 0.0  ;;  %v661_v9 = vpop.f32.mrb[8].mxu1 }
 0x243   :  { %v1184_v10 = vpack.c.bf16 %v690_v6, %v688_v5  ;;  %v663_v11 = vpop.f32.mrb[9].mxu1  ;;  %v662_v14 = vadd.f32 %v661_v9, %v554_v12 }
 0x244   :  { %v1182_v13 = vpack.c.bf16 %v691_v8, %v689_v7  ;;  %v664_v15 = vadd.f32 %v663_v11, %v554_v12 }
 0x245   :  { %v692_v20 = vmax.f32 %v662_v14, 0.0 }
 0x246   :  { %v667_v16 = vpop.f32.mrb[10].mxu1  ;;  %1183 = vmatprep.subr.bf16.mxu1 %v1182_v13  ;;  %v693_v22 = vmax.f32 %v664_v15, 0.0  ;;  %v842_v15 = vpop.permute.xlu0 %841 }
 0x247   :  { %v668_v18 = vadd.f32 %v667_v16, %v559_v4  ;;  %v669_v17 = vpop.f32.mrb[11].mxu1  ;;  %1185 = vmatpush1.bf16.msra.mxu1 %v1184_v10 }
 0x248   :  { %v670_v19 = vadd.f32 %v669_v17, %v559_v4  ;;  %v837_v4 = vld [vmem:[%s1680_s7] sm:$0x3]  ;;  %s1249_s7 = smov [#allocation2]  }
 0x249   :  { %v694_v21 = vmax.f32 %v668_v18, 0.0  ;;  %s972_s25 = sshll.u32 %s1249_s7, 4  ;;  %s973_s25 = int_to_ptr.vmem [resolvable:$true] %s972_s25 }
 0x24a   :  { %v695_v23 = vmax.f32 %v670_v19, 0.0  ;;  %v673_v24 = vpop.f32.mrb[12].mxu1  ;;  %s1223_s26 = scalar_lea.vmem %s973_s25, 64  ;;  %p1228_p1 = scmp.lt.s32.totalorder %s973_s25, %s973_s25 }
 0x24b   :  { %v1188_v25 = vpack.c.bf16 %v694_v21, %v692_v20  ;;  %v675_v26 = vpop.f32.mrb[13].mxu1  ;;  %v674_v29 = vadd.f32 %v673_v24, %v564_v27  ;;  %p1224_p0 = scmp.ne.s32.totalorder %s973_s25, %s1223_s26  ;;  %p1229_p2 = scmp.lt.s32.totalorder %s1223_s26, %s1223_s26 }
 0x24c   :  { %v1186_v28 = vpack.c.bf16 %v695_v23, %v693_v22  ;;  %v676_v32 = vadd.f32 %v675_v26, %v564_v27 }
 0x24d   :  { %v696_v37 = vmax.f32 %v674_v29, 0.0  ;;  %p1230_p3 = por %p1229_p2, %p1228_p1 }
 0x24e   :  { %v679_v33 = vpop.f32.mrb[14].mxu1  ;;  %1187 = vmatprep.subr.bf16.mxu1 %v1186_v28  ;;  %v697_v39 = vmax.f32 %v676_v32, 0.0 }
 0x24f   :  { %v680_v34 = vadd.f32 %v679_v33, %v569_v30  ;;  %v681_v35 = vpop.f32.mrb[15].mxu1  ;;  %1189 = vmatpush1.bf16.msra.mxu1 %v1188_v25  ;;  %p1231_p4 = pnand %p1230_p3, %p1224_p0 }
 0x250   :  { %v682_v36 = vadd.f32 %v681_v35, %v569_v30 }
 0x251   :  { %v698_v38 = vmax.f32 %v680_v34, 0.0 }
 0x252   :  { %v699_v40 = vmax.f32 %v682_v36, 0.0 }
 0x253   :  { %v1192_v41 = vpack.c.bf16 %v698_v38, %v696_v37 }
 0x254   :  { %v1190_v42 = vpack.c.bf16 %v699_v40, %v697_v39 }
 0x256   :  { %1191 = vmatprep.subr.bf16.mxu1 %v1190_v42 }
 0x257   :  { %1193 = vmatpush1.bf16.msra.mxu1 %v1192_v41 }
 0x25a   :  { %1028 = vmatmul.mubr.msk.f32.vlgmr.msra.gmra.mrb[16].mxu1 %vm177_vm0, %v700_v43 }
 0x25b   :  { %810 = vmatprep.mubr.f32.mxu1 %v1248_v31 }
 0x25e   :  { %1029 = vmatmul.mubr.msk.f32.gmra.mrb[18].mxu1 %vm177_vm0, %v701_v44 }
 0x25f   :  { %816 = vmatprep.mubr.f32.mxu1 %v1248_v31 }
 0x262   :  { %1030 = vmatmul.mubr.msk.f32.gmra.mrb[20].mxu1 %vm177_vm0, %v702_v45 }
 0x263   :  { %822 = vmatprep.mubr.f32.mxu1 %v1248_v31 }
 0x266   :  { %1031 = vmatmul.mubr.msk.f32.gmra.mrb[22].mxu1 %vm177_vm0, %v703_v46 }
 0x267   :  { %912 = vmatprep.mubr.f32.mxu1 %v1248_v31 }
 0x32d   :  { %v806_v47 = vpop.f32.mrb[16].mxu1 }
 0x32e   :  { %v808_v48 = vpop.f32.mrb[17].mxu1  ;;  %v807_v50 = vadd.f32 %v806_v47, %v711_v49 }
 0x32f   :  { %v809_v52 = vadd.f32 %v808_v48, %v711_v49 }
 0x330   :  { %v829_v57 = vmax.f32 %v807_v50, 0.0 }
 0x331   :  { %v812_v53 = vpop.f32.mrb[18].mxu1  ;;  %v830_v59 = vmax.f32 %v809_v52, 0.0 }
 0x332   :  { %v813_v54 = vadd.f32 %v812_v53, %v716_v51  ;;  %v814_v55 = vpop.f32.mrb[19].mxu1 }
 0x333   :  { %v815_v56 = vadd.f32 %v814_v55, %v716_v51 }
 0x334   :  { %v831_v58 = vmax.f32 %v813_v54, 0.0 }
 0x335   :  { %v832_v60 = vmax.f32 %v815_v56, 0.0  ;;  %v818_v61 = vpop.f32.mrb[20].mxu1 }
 0x336   :  { %v1196_v62 = vpack.c.bf16 %v831_v58, %v829_v57  ;;  %v820_v63 = vpop.f32.mrb[21].mxu1  ;;  %v819_v31 = vadd.f32 %v818_v61, %v721_v0 }
 0x337   :  { %v1194_v1 = vpack.c.bf16 %v832_v60, %v830_v59  ;;  %v821_v3 = vadd.f32 %v820_v63, %v721_v0 }
 0x338   :  { %v833_v9 = vmax.f32 %v819_v31, 0.0 }
 0x339   :  { %v824_v5 = vpop.f32.mrb[22].mxu1  ;;  %1195 = vmatprep.subr.bf16.mxu1 %v1194_v1  ;;  %v834_v11 = vmax.f32 %v821_v3, 0.0 }
 0x33a   :  { %v825_v6 = vadd.f32 %v824_v5, %v726_v2  ;;  %v826_v7 = vpop.f32.mrb[23].mxu1  ;;  %1197 = vmatpush1.bf16.msra.mxu1 %v1196_v62 }
 0x33b   :  { %v827_v8 = vadd.f32 %v826_v7, %v726_v2 }
 0x33c   :  { %v835_v10 = vmax.f32 %v825_v6, 0.0 }
 0x33d   :  { %v836_v12 = vmax.f32 %v827_v8, 0.0 }
 0x33e   :  { %v1200_v13 = vpack.c.bf16 %v835_v10, %v833_v9 }
 0x33f   :  { %v1198_v14 = vpack.c.bf16 %v836_v12, %v834_v11 }
 0x341   :  { %1199 = vmatprep.subr.bf16.mxu1 %v1198_v14 }
 0x342   :  { %1201 = vmatpush1.bf16.msra.mxu1 %v1200_v13 }
 0x345   :  { %1032 = vmatmul.mubr.msk.f32.vlgmr.msra.gmra.mrb[24].mxu1 %vm844_vm2, %v837_v4 }
 0x418   :  { %v914_v16 = vpop.f32.mrb[24].mxu1 }
 0x419   :  { %v915_v18 = vadd.f32 %v914_v16, %v842_v15  ;;  %v916_v17 = vpop.f32.mrb[25].mxu1 }
 0x41a   :  { %v917_v19 = vadd.f32 %v916_v17, %v842_v15 }
 0x41b   :  { %v919_v20 = vsub.f32 0.0, %v915_v18 }
 0x41c   :  { %v920_v21 = vsub.f32 0.0, %v917_v19 }
 0x41d   :  { %v921_v22 = vmul.f32 1.442695, %v919_v20 }
 0x41e   :  { %v923_v23 = vmul.f32 1.442695, %v920_v21 }
 0x41f   :  { %1207 = vpow2.f32 %v921_v22 }
 0x420   :  { %1209 = vpow2.f32 %v923_v23 }
 0x429   :  { %v1208_v24 = vpop.eup %1207 }
 0x42a   :  { %v1210_v25 = vpop.eup %1209  ;;  %v925_v26 = vadd.f32 1.0, %v1208_v24 }
 0x42b   :  { %v926_v27 = vadd.f32 1.0, %v1210_v25 }
 0x42c   :  { %1211 = vrcp.f32 %v925_v26 }
 0x42d   :  { %1213 = vrcp.f32 %v926_v27 }
 0x436   :  { %v1212_v28 = vpop.eup %1211 }
 0x437   :  { %v1214_v29 = vpop.eup %1213  ;;  %v931_v30 = vmul.f32 1.442695, %v1212_v28 }
 0x438   :  { %v933_v32 = vmul.f32 1.442695, %v1214_v29 }
 0x439   :  { %1215 = vpow2.f32 %v931_v30 }
 0x43a   :  { %1217 = vpow2.f32 %v933_v32 }
 0x443   :  { %v1216_v33 = vpop.eup %1215 }
 0x444   :  { %v1218_v34 = vpop.eup %1217  ;;  %v936_v35 = vsel %vm935_vm3, %v1216_v33, 0.0 }
 0x445   :  { %v937_v36 = vrot.slane %v936_v35, 4  ;;  %v943_v37 = vsel %vm935_vm3, %v1218_v34, 0.0 }
 0x446   :  { %v944_v38 = vrot.slane %v943_v37, 4 }
 0x447   :  { %v938_v39 = vadd.f32 %v937_v36, %v936_v35 }
 0x448   :  { %v945_v40 = vadd.f32 %v944_v38, %v943_v37 }
 0x449   :  { %v939_v41 = vrot.slane %v938_v39, 2 }
 0x44a   :  { %v946_v42 = vrot.slane %v945_v40, 2 }
 0x44b   :  { %v940_v43 = vadd.f32 %v939_v41, %v938_v39 }
 0x44c   :  { %v947_v44 = vadd.f32 %v946_v42, %v945_v40 }
 0x44d   :  { %v941_v45 = vrot.slane %v940_v43, 1 }
 0x44e   :  { %v948_v46 = vrot.slane %v947_v44, 1 }
 0x44f   :  { %v942_v47 = vadd.f32 %v941_v45, %v940_v43 }
 0x450   :  { %v949_v48 = vadd.f32 %v948_v46, %v947_v44 }
 0x451   :  { %1219 = vrcp.f32 %v942_v47 }
 0x452   :  { %1221 = vrcp.f32 %v949_v48 }
 0x45b   :  { %v1220_v49 = vpop.eup %1219 }
 0x45c   :  { %v1222_v50 = vpop.eup %1221  ;;  %v951_v51 = vmul.f32 %v1220_v49, %v1216_v33 }
 0x45d   :  { %v953_v52 = vmul.f32 %v1222_v50, %v1218_v34 }
 0x45f   :  { %v956_v53 = vcombine.low %v951_v51, %v953_v52 }
 0x461   :  { %1033 = vst.sshfl [vmem:[#allocation2] sm:$0x33 pattern:$0x76325410] %v956_v53 }
 0x462   :  { %1234 = shalt.err (!%p1231_p4)
}
 0x463   :  { %s1235_s28 = scalar_lea.hbm %s1682_s9, 64 }
 0x464   :  { %p1236_p5 = scmp.ne.s32.totalorder %s1682_s9, %s1235_s28  ;;  %p1239_p6 = scmp.lt.u32.totalorder %s1235_s28, %s1682_s9 }
 0x466   :  { %p1241_p7 = pnand %p1239_p6, %p1236_p5 }
 0x468   :  { %1244 = shalt.err (!%p1241_p7)
}
 0x469   :  { %975 = dma.vmem_to_hbm [thread:$0]  %s973_s25, 64, %s1682_s9, [#allocation3]  }
 0x46a   :  { %1245 = dma.done.wait [#allocation3], 64  }
 0x46b   :  { %1246 = vsyncadd [#allocation3], 4294967232 }
 0x46c   :  { %979 = vsyncpa [#allocation3], 1 }

</bundles_post_ra>
